<compile_context>
chip_gen: v7x
topology: tpu7x:2x2x1
jax: 0.10.0
libtpu: 0.0.40
codegen_flags: <defaults>
</compile_context>

<pallas_src>
import numpy as np
import jax
import jax.numpy as jnp
from jax import lax
from jax.experimental import pallas as pl
from jax.experimental.pallas import tpu as pltpu


# ----------------------------------------------------------------------------
# Fused multi-layer LSTM + classifier kernel (no grid, single invocation).
# ----------------------------------------------------------------------------
def _make_fused_kernel(S, Bp, H, nlayers):
    def kernel(*refs):
        # ---- unpack refs ----------------------------------------------------
        idx = 0
        x_ref = refs[idx]; idx += 1                          # (S*Bp, E)
        layer_refs = []
        for _ in range(nlayers):
            layer_refs.append((refs[idx], refs[idx + 1], refs[idx + 2]))
            idx += 3                                         # W_ih^T, W_hh^T, b
        h0_ref = refs[idx]; c0_ref = refs[idx + 1]; idx += 2  # (L, Bp, H)
        cls_w_ref = refs[idx]; cls_b_ref = refs[idx + 1]; idx += 2
        out_ref = refs[idx]; idx += 1                        # (Bp, C)
        gates_scr, hslab_scr, h_scr, c_scr, hsum_scr = refs[idx:idx + 5]

        cur = x_ref[...]                                     # (S*Bp, in_dim)
        for l in range(nlayers):
            w_ih_ref, w_hh_ref, b_ref = layer_refs[l]
            last = (l == nlayers - 1)

            # Hoisted input projection: one big matmul (M = S*Bp rows) for the
            # whole sequence, instead of a tiny M=Bp matmul per timestep.
            gates_scr[...] = (
                jnp.dot(cur, w_ih_ref[...], preferred_element_type=jnp.float32)
                + b_ref[...])

            h_scr[...] = h0_ref[l]
            c_scr[...] = c0_ref[l]
            if last:
                hsum_scr[...] = jnp.zeros_like(hsum_scr)

            def run_timesteps(w_hh, last=last):
                # w_hh loaded once, held in vregs across the whole time loop.
                @pl.loop(0, S)
                def _(t):
                    r = pl.multiple_of(t * Bp, Bp)
                    h = h_scr[...]
                    gates = (gates_scr[pl.ds(r, Bp), :]
                             + jnp.dot(h, w_hh,
                                       preferred_element_type=jnp.float32))
                    # Full-width nonlinearities over the (Bp, 4H) tile, then
                    # lane slices for i/f/g/o.
                    sig = jax.nn.sigmoid(gates)
                    th = jnp.tanh(gates)
                    i_g = sig[:, 0 * H:1 * H]
                    f_g = sig[:, 1 * H:2 * H]
                    g_g = th[:, 2 * H:3 * H]
                    o_g = sig[:, 3 * H:4 * H]
                    c = f_g * c_scr[...] + i_g * g_g
                    h_new = o_g * jnp.tanh(c)
                    c_scr[...] = c
                    h_scr[...] = h_new
                    if last:
                        hsum_scr[...] += h_new           # running sum for mean
                    else:
                        hslab_scr[pl.ds(r, Bp), :] = h_new

            run_timesteps(w_hh_ref[...])

            if not last:
                cur = hslab_scr[...]                     # next layer's input

        # Classifier: mean over time BEFORE the matmul (exact: Linear is
        # affine), then one (Bp,H)@(H,C) dot + bias.
        h_mean = hsum_scr[...] * jnp.float32(1.0 / S)
        out_ref[...] = (
            jnp.dot(h_mean, cls_w_ref[...], preferred_element_type=jnp.float32)
            + cls_b_ref[...])

    return kernel


def fused_lstm_classifier(x2d, lstm_params, h0, c0, cls_w_t, cls_b, *, S, Bp, H):
    nlayers = len(lstm_params)
    C = cls_w_t.shape[-1]

    inputs = [x2d]
    for (w_ih_t, w_hh_t, b) in lstm_params:
        inputs += [w_ih_t, w_hh_t, b]
    inputs += [h0, c0, cls_w_t, cls_b]

    vmem = pltpu.MemorySpace.VMEM
    in_specs = [pl.BlockSpec(memory_space=vmem) for _ in inputs]

    # Advisory cost estimate so XLA schedules this tiny custom call sensibly.
    flops = 0
    for (w_ih_t, _, _) in lstm_params:
        flops += 2 * S * Bp * (w_ih_t.shape[0] + H) * 4 * H
    flops += 2 * Bp * H * C
    transcendentals = nlayers * S * Bp * 4 * H * 3
    bytes_accessed = int(sum(int(np.prod(a.shape)) * a.dtype.itemsize
                             for a in inputs) + Bp * C * 4)

    return pl.pallas_call(
        _make_fused_kernel(S, Bp, H, nlayers),
        out_shape=jax.ShapeDtypeStruct((Bp, C), jnp.float32),
        in_specs=in_specs,
        out_specs=pl.BlockSpec(memory_space=vmem),
        scratch_shapes=[
            pltpu.VMEM((S * Bp, 4 * H), jnp.float32),   # hoisted gate pre-acts
            pltpu.VMEM((S * Bp, H), jnp.float32),       # inter-layer h slab
            pltpu.VMEM((Bp, H), jnp.float32),           # h state
            pltpu.VMEM((Bp, H), jnp.float32),           # c state
            pltpu.VMEM((Bp, H), jnp.float32),           # sum_t h (for the mean)
        ],
        cost_estimate=pl.CostEstimate(flops=int(flops),
                                      transcendentals=int(transcendentals),
                                      bytes_accessed=bytes_accessed),
    )(*inputs)


# ----------------------------------------------------------------------------
# Parameter construction (deterministic, mirrors nn.Embedding / nn.LSTM /
# nn.Linear shapes from __init__). Weights are stored pre-transposed.
# ----------------------------------------------------------------------------
def init_params(key, vocab_size, embedding_size, nhid, nlayers, n_classes=6):
    def u(k, shape, scale=0.1):
        return jax.random.uniform(k, shape, jnp.float32, -scale, scale)

    keys = jax.random.split(key, 3 + 4 * nlayers)
    params = {}
    params['embedding'] = u(keys[0], (vocab_size, embedding_size))
    lstm = []
    for l in range(nlayers):
        in_size = embedding_size if l == 0 else nhid
        k0, k1, k2, k3 = keys[1 + 4 * l: 5 + 4 * l]
        w_ih = u(k0, (4 * nhid, in_size))        # torch weight_ih_l{l} (i,f,g,o)
        w_hh = u(k1, (4 * nhid, nhid))           # torch weight_hh_l{l}
        b_ih = u(k2, (4 * nhid,))
        b_hh = u(k3, (4 * nhid,))
        lstm.append((w_ih.T, w_hh.T, (b_ih + b_hh).reshape(1, 4 * nhid)))
    params['lstm'] = lstm
    params['cls_w_t'] = u(keys[-2], (n_classes, nhid)).T        # (H, 6)
    params['cls_b'] = u(keys[-1], (n_classes,)).reshape(1, n_classes)
    return params


def init_hidden(nlayers, bsz, nhid):
    z = jnp.zeros((nlayers, bsz, nhid), jnp.float32)
    return (z, z)


# ----------------------------------------------------------------------------
# Forward pass mirroring Word_Embeddings_sequence_model.forward
# ----------------------------------------------------------------------------
def forward(params, inputs, hidden, eval=False, seq_window=100):
    B, seq_length = inputs.shape
    sw = seq_length if (seq_length < seq_window or eval) else seq_window
    rest = seq_length - sw
    # Host-side random crop start (matches np.random.randint in the reference).
    rand_start = int(np.random.randint(rest)) if rest > 0 else 0
    cropped = lax.dynamic_slice_in_dim(inputs, rand_start, sw, axis=1)  # (B, sw)

    # Embedding gather directly into time-major layout: (sw, B, E).
    emb = jnp.take(params['embedding'], jnp.transpose(cropped), axis=0)

    nlayers = len(params['lstm'])
    H = params['lstm'][0][1].shape[0]
    C = params['cls_w_t'].shape[-1]

    # Pad the batch up to a multiple of 8 so every vreg sublane / MXU row of
    # the in-kernel tiles is used; padded rows are zeros and sliced off after.
    Bp = max(8, -(-B // 8) * 8)
    pad = Bp - B
    h0_all, c0_all = hidden
    if pad:
        emb = jnp.pad(emb, ((0, 0), (0, pad), (0, 0)))
        h0_all = jnp.pad(h0_all, ((0, 0), (0, pad), (0, 0)))
        c0_all = jnp.pad(c0_all, ((0, 0), (0, pad), (0, 0)))
    x2d = emb.reshape(sw * Bp, emb.shape[-1])           # (S*Bp, E), time-major

    # TODO(synk): nn.LSTM inter-layer dropout (p=0.5, training mode) is
    # stochastic and omitted here.
    out = fused_lstm_classifier(x2d, params['lstm'], h0_all, c0_all,
                                params['cls_w_t'], params['cls_b'],
                                S=sw, Bp=Bp, H=H)
    return out[:B].reshape(-1, C)


if __name__ == "__main__":
    np.random.seed(0)
    key = jax.random.PRNGKey(0)

    vocab_size, embedding_size, nhid, nlayers = 50, 32, 32, 2
    B, S = 2, 8

    k_params, k_inputs = jax.random.split(key)
    params = init_params(k_params, vocab_size, embedding_size, nhid, nlayers)
    inputs = jax.random.randint(k_inputs, (B, S), 0, vocab_size, dtype=jnp.int32)
    hidden = init_hidden(nlayers, B, nhid)

    out = forward(params, inputs, hidden, eval=False)
    out = jax.block_until_ready(out)
    assert out.shape == (B, 6) and out.dtype == jnp.float32
    assert bool(jnp.all(jnp.isfinite(out)))
    print("KERNEL_OK")
</pallas_src>

<mosaic_0001>
module attributes {stable_mosaic.version = 11 : i64} {
  func.func @kernel(%arg0: memref<64x32xf32, #tpu.memory_space<vmem>>, %arg1: memref<32x128xf32, #tpu.memory_space<vmem>>, %arg2: memref<32x128xf32, #tpu.memory_space<vmem>>, %arg3: memref<1x128xf32, #tpu.memory_space<vmem>>, %arg4: memref<32x128xf32, #tpu.memory_space<vmem>>, %arg5: memref<32x128xf32, #tpu.memory_space<vmem>>, %arg6: memref<1x128xf32, #tpu.memory_space<vmem>>, %arg7: memref<2x8x32xf32, #tpu.memory_space<vmem>>, %arg8: memref<2x8x32xf32, #tpu.memory_space<vmem>>, %arg9: memref<32x6xf32, #tpu.memory_space<vmem>>, %arg10: memref<1x6xf32, #tpu.memory_space<vmem>>, %arg11: memref<8x6xf32, #tpu.memory_space<vmem>>, %arg12: memref<64x128xf32, #tpu.memory_space<vmem>>, %arg13: memref<64x32xf32, #tpu.memory_space<vmem>>, %arg14: memref<8x32xf32, #tpu.memory_space<vmem>>, %arg15: memref<8x32xf32, #tpu.memory_space<vmem>>, %arg16: memref<8x32xf32, #tpu.memory_space<vmem>>) attributes {dimension_semantics = [], scalar_prefetch = 0 : i64, scratch_operands = 5 : i64, tpu.core_type = #tpu.core_type<tc>} {
    %c0 = arith.constant 0 : index
    %c0_0 = arith.constant 0 : index
    %0 = vector.load %arg0[%c0, %c0_0] : memref<64x32xf32, #tpu.memory_space<vmem>>, vector<64x32xf32>
    %c0_1 = arith.constant 0 : index
    %c0_2 = arith.constant 0 : index
    %1 = vector.load %arg1[%c0_1, %c0_2] : memref<32x128xf32, #tpu.memory_space<vmem>>, vector<32x128xf32>
    %cst = arith.constant dense<0.000000e+00> : vector<64x128xf32>
    %2 = tpu.matmul %0, %1, %cst {dimension_numbers = #tpu.dot_dimension_numbers<[1], [0], [0], [1], [0, 0, 1, 1], [], []>} : vector<64x32xf32>, vector<32x128xf32>, vector<64x128xf32> -> vector<64x128xf32>
    %c0_3 = arith.constant 0 : index
    %c0_4 = arith.constant 0 : index
    %3 = vector.load %arg3[%c0_3, %c0_4] : memref<1x128xf32, #tpu.memory_space<vmem>>, vector<1x128xf32>
    %4 = vector.broadcast %3 : vector<1x128xf32> to vector<64x128xf32>
    %5 = arith.addf %2, %4 : vector<64x128xf32>
    %c0_5 = arith.constant 0 : index
    %c0_6 = arith.constant 0 : index
    %6 = vector.load %arg12[%c0_5, %c0_6] : memref<64x128xf32, #tpu.memory_space<vmem>>, vector<64x128xf32>
    tpu.vector_store %arg12[%c0_5, %c0_6], %5 {strides = array<i32>} : memref<64x128xf32, #tpu.memory_space<vmem>>, vector<64x128xf32>,
    %c0_7 = arith.constant 0 : index
    %c0_8 = arith.constant 0 : index
    %c0_9 = arith.constant 0 : index
    %7 = vector.load %arg7[%c0_7, %c0_8, %c0_9] : memref<2x8x32xf32, #tpu.memory_space<vmem>>, vector<1x8x32xf32>
    %8 = vector.shape_cast %7 : vector<1x8x32xf32> to vector<8x32xf32>
    %c0_10 = arith.constant 0 : index
    %c0_11 = arith.constant 0 : index
    %9 = vector.load %arg14[%c0_10, %c0_11] : memref<8x32xf32, #tpu.memory_space<vmem>>, vector<8x32xf32>
    tpu.vector_store %arg14[%c0_10, %c0_11], %8 {strides = array<i32>} : memref<8x32xf32, #tpu.memory_space<vmem>>, vector<8x32xf32>,
    %c0_12 = arith.constant 0 : index
    %c0_13 = arith.constant 0 : index
    %c0_14 = arith.constant 0 : index
    %10 = vector.load %arg8[%c0_12, %c0_13, %c0_14] : memref<2x8x32xf32, #tpu.memory_space<vmem>>, vector<1x8x32xf32>
    %11 = vector.shape_cast %10 : vector<1x8x32xf32> to vector<8x32xf32>
    %c0_15 = arith.constant 0 : index
    %c0_16 = arith.constant 0 : index
    %12 = vector.load %arg15[%c0_15, %c0_16] : memref<8x32xf32, #tpu.memory_space<vmem>>, vector<8x32xf32>
    tpu.vector_store %arg15[%c0_15, %c0_16], %11 {strides = array<i32>} : memref<8x32xf32, #tpu.memory_space<vmem>>, vector<8x32xf32>,
    %c0_17 = arith.constant 0 : index
    %c0_18 = arith.constant 0 : index
    %13 = vector.load %arg2[%c0_17, %c0_18] : memref<32x128xf32, #tpu.memory_space<vmem>>, vector<32x128xf32>
    %c0_i32 = arith.constant 0 : i32
    %c8_i32 = arith.constant 8 : i32
    %14 = arith.addi %c0_i32, %c8_i32 : i32
    %c1_i32 = arith.constant 1 : i32
    scf.for %arg17 = %c0_i32 to %14 step %c1_i32  : i32 {
      %c1_i32_57 = arith.constant 1 : i32
      %41 = arith.muli %arg17, %c1_i32_57 : i32
      %c0_i32_58 = arith.constant 0 : i32
      %42 = arith.addi %c0_i32_58, %41 : i32
      %c8_i32_59 = arith.constant 8 : i32
      %43 = arith.muli %42, %c8_i32_59 : i32
      %44 = tpu.assume_multiple %43, 8 : i32
      %c0_60 = arith.constant 0 : index
      %c0_61 = arith.constant 0 : index
      %45 = vector.load %arg14[%c0_60, %c0_61] : memref<8x32xf32, #tpu.memory_space<vmem>>, vector<8x32xf32>
      %46 = arith.index_cast %44 : i32 to index
      %c0_62 = arith.constant 0 : index
      %47 = vector.load %arg12[%46, %c0_62] : memref<64x128xf32, #tpu.memory_space<vmem>>, vector<8x128xf32>
      %cst_63 = arith.constant dense<0.000000e+00> : vector<8x128xf32>
      %48 = tpu.matmul %45, %13, %cst_63 {dimension_numbers = #tpu.dot_dimension_numbers<[1], [0], [0], [1], [0, 0, 1, 1], [], []>} : vector<8x32xf32>, vector<32x128xf32>, vector<8x128xf32> -> vector<8x128xf32>
      %49 = arith.addf %47, %48 : vector<8x128xf32>
      %50 = arith.negf %49 : vector<8x128xf32>
      %51 = math.exp %50 : vector<8x128xf32>
      %cst_64 = arith.constant 1.000000e+00 : f32
      %52 = vector.broadcast %cst_64 : f32 to vector<8x128xf32>
      %53 = arith.addf %52, %51 : vector<8x128xf32>
      %54 = arith.divf %52, %53 : vector<8x128xf32>
      %55 = math.tanh %49 : vector<8x128xf32>
      %56 = vector.extract_strided_slice %54 {offsets = [0, 0], sizes = [8, 32], strides = [1, 1]} : vector<8x128xf32> to vector<8x32xf32>
      %57 = vector.extract_strided_slice %54 {offsets = [0, 32], sizes = [8, 32], strides = [1, 1]} : vector<8x128xf32> to vector<8x32xf32>
      %58 = vector.extract_strided_slice %55 {offsets = [0, 64], sizes = [8, 32], strides = [1, 1]} : vector<8x128xf32> to vector<8x32xf32>
      %59 = vector.extract_strided_slice %54 {offsets = [0, 96], sizes = [8, 32], strides = [1, 1]} : vector<8x128xf32> to vector<8x32xf32>
      %c0_65 = arith.constant 0 : index
      %c0_66 = arith.constant 0 : index
      %60 = vector.load %arg15[%c0_65, %c0_66] : memref<8x32xf32, #tpu.memory_space<vmem>>, vector<8x32xf32>
      %61 = arith.mulf %57, %60 : vector<8x32xf32>
      %62 = arith.mulf %56, %58 : vector<8x32xf32>
      %63 = arith.addf %61, %62 : vector<8x32xf32>
      %64 = math.tanh %63 : vector<8x32xf32>
      %65 = arith.mulf %59, %64 : vector<8x32xf32>
      %c0_67 = arith.constant 0 : index
      %c0_68 = arith.constant 0 : index
      %66 = vector.load %arg15[%c0_67, %c0_68] : memref<8x32xf32, #tpu.memory_space<vmem>>, vector<8x32xf32>
      tpu.vector_store %arg15[%c0_67, %c0_68], %63 {strides = array<i32>} : memref<8x32xf32, #tpu.memory_space<vmem>>, vector<8x32xf32>,
      %c0_69 = arith.constant 0 : index
      %c0_70 = arith.constant 0 : index
      %67 = vector.load %arg14[%c0_69, %c0_70] : memref<8x32xf32, #tpu.memory_space<vmem>>, vector<8x32xf32>
      tpu.vector_store %arg14[%c0_69, %c0_70], %65 {strides = array<i32>} : memref<8x32xf32, #tpu.memory_space<vmem>>, vector<8x32xf32>,
      %68 = arith.index_cast %44 : i32 to index
      %c0_71 = arith.constant 0 : index
      %69 = vector.load %arg13[%68, %c0_71] : memref<64x32xf32, #tpu.memory_space<vmem>>, vector<8x32xf32>
      tpu.vector_store %arg13[%68, %c0_71], %65 {strides = array<i32>} : memref<64x32xf32, #tpu.memory_space<vmem>>, vector<8x32xf32>,
    }
    %c8_i32_19 = arith.constant 8 : i32
    %c0_20 = arith.constant 0 : index
    %c0_21 = arith.constant 0 : index
    %15 = vector.load %arg13[%c0_20, %c0_21] : memref<64x32xf32, #tpu.memory_space<vmem>>, vector<64x32xf32>
    %c0_22 = arith.constant 0 : index
    %c0_23 = arith.constant 0 : index
    %16 = vector.load %arg4[%c0_22, %c0_23] : memref<32x128xf32, #tpu.memory_space<vmem>>, vector<32x128xf32>
    %cst_24 = arith.constant dense<0.000000e+00> : vector<64x128xf32>
    %17 = tpu.matmul %15, %16, %cst_24 {dimension_numbers = #tpu.dot_dimension_numbers<[1], [0], [0], [1], [0, 0, 1, 1], [], []>} : vector<64x32xf32>, vector<32x128xf32>, vector<64x128xf32> -> vector<64x128xf32>
    %c0_25 = arith.constant 0 : index
    %c0_26 = arith.constant 0 : index
    %18 = vector.load %arg6[%c0_25, %c0_26] : memref<1x128xf32, #tpu.memory_space<vmem>>, vector<1x128xf32>
    %19 = vector.broadcast %18 : vector<1x128xf32> to vector<64x128xf32>
    %20 = arith.addf %17, %19 : vector<64x128xf32>
    %c0_27 = arith.constant 0 : index
    %c0_28 = arith.constant 0 : index
    %21 = vector.load %arg12[%c0_27, %c0_28] : memref<64x128xf32, #tpu.memory_space<vmem>>, vector<64x128xf32>
    tpu.vector_store %arg12[%c0_27, %c0_28], %20 {strides = array<i32>} : memref<64x128xf32, #tpu.memory_space<vmem>>, vector<64x128xf32>,
    %c1 = arith.constant 1 : index
    %c0_29 = arith.constant 0 : index
    %c0_30 = arith.constant 0 : index
    %22 = vector.load %arg7[%c1, %c0_29, %c0_30] : memref<2x8x32xf32, #tpu.memory_space<vmem>>, vector<1x8x32xf32>
    %23 = vector.shape_cast %22 : vector<1x8x32xf32> to vector<8x32xf32>
    %c0_31 = arith.constant 0 : index
    %c0_32 = arith.constant 0 : index
    %24 = vector.load %arg14[%c0_31, %c0_32] : memref<8x32xf32, #tpu.memory_space<vmem>>, vector<8x32xf32>
    tpu.vector_store %arg14[%c0_31, %c0_32], %23 {strides = array<i32>} : memref<8x32xf32, #tpu.memory_space<vmem>>, vector<8x32xf32>,
    %c1_33 = arith.constant 1 : index
    %c0_34 = arith.constant 0 : index
    %c0_35 = arith.constant 0 : index
    %25 = vector.load %arg8[%c1_33, %c0_34, %c0_35] : memref<2x8x32xf32, #tpu.memory_space<vmem>>, vector<1x8x32xf32>
    %26 = vector.shape_cast %25 : vector<1x8x32xf32> to vector<8x32xf32>
    %c0_36 = arith.constant 0 : index
    %c0_37 = arith.constant 0 : index
    %27 = vector.load %arg15[%c0_36, %c0_37] : memref<8x32xf32, #tpu.memory_space<vmem>>, vector<8x32xf32>
    tpu.vector_store %arg15[%c0_36, %c0_37], %26 {strides = array<i32>} : memref<8x32xf32, #tpu.memory_space<vmem>>, vector<8x32xf32>,
    %cst_38 = arith.constant 0.000000e+00 : f32
    %28 = vector.broadcast %cst_38 : f32 to vector<8x32xf32>
    %c0_39 = arith.constant 0 : index
    %c0_40 = arith.constant 0 : index
    %29 = vector.load %arg16[%c0_39, %c0_40] : memref<8x32xf32, #tpu.memory_space<vmem>>, vector<8x32xf32>
    tpu.vector_store %arg16[%c0_39, %c0_40], %28 {strides = array<i32>} : memref<8x32xf32, #tpu.memory_space<vmem>>, vector<8x32xf32>,
    %c0_41 = arith.constant 0 : index
    %c0_42 = arith.constant 0 : index
    %30 = vector.load %arg5[%c0_41, %c0_42] : memref<32x128xf32, #tpu.memory_space<vmem>>, vector<32x128xf32>
    %c0_i32_43 = arith.constant 0 : i32
    %c8_i32_44 = arith.constant 8 : i32
    %31 = arith.addi %c0_i32_43, %c8_i32_44 : i32
    %c1_i32_45 = arith.constant 1 : i32
    scf.for %arg17 = %c0_i32_43 to %31 step %c1_i32_45  : i32 {
      %c1_i32_57 = arith.constant 1 : i32
      %41 = arith.muli %arg17, %c1_i32_57 : i32
      %c0_i32_58 = arith.constant 0 : i32
      %42 = arith.addi %c0_i32_58, %41 : i32
      %c8_i32_59 = arith.constant 8 : i32
      %43 = arith.muli %42, %c8_i32_59 : i32
      %44 = tpu.assume_multiple %43, 8 : i32
      %c0_60 = arith.constant 0 : index
      %c0_61 = arith.constant 0 : index
      %45 = vector.load %arg14[%c0_60, %c0_61] : memref<8x32xf32, #tpu.memory_space<vmem>>, vector<8x32xf32>
      %46 = arith.index_cast %44 : i32 to index
      %c0_62 = arith.constant 0 : index
      %47 = vector.load %arg12[%46, %c0_62] : memref<64x128xf32, #tpu.memory_space<vmem>>, vector<8x128xf32>
      %cst_63 = arith.constant dense<0.000000e+00> : vector<8x128xf32>
      %48 = tpu.matmul %45, %30, %cst_63 {dimension_numbers = #tpu.dot_dimension_numbers<[1], [0], [0], [1], [0, 0, 1, 1], [], []>} : vector<8x32xf32>, vector<32x128xf32>, vector<8x128xf32> -> vector<8x128xf32>
      %49 = arith.addf %47, %48 : vector<8x128xf32>
      %50 = arith.negf %49 : vector<8x128xf32>
      %51 = math.exp %50 : vector<8x128xf32>
      %cst_64 = arith.constant 1.000000e+00 : f32
      %52 = vector.broadcast %cst_64 : f32 to vector<8x128xf32>
      %53 = arith.addf %52, %51 : vector<8x128xf32>
      %54 = arith.divf %52, %53 : vector<8x128xf32>
      %55 = math.tanh %49 : vector<8x128xf32>
      %56 = vector.extract_strided_slice %54 {offsets = [0, 0], sizes = [8, 32], strides = [1, 1]} : vector<8x128xf32> to vector<8x32xf32>
      %57 = vector.extract_strided_slice %54 {offsets = [0, 32], sizes = [8, 32], strides = [1, 1]} : vector<8x128xf32> to vector<8x32xf32>
      %58 = vector.extract_strided_slice %55 {offsets = [0, 64], sizes = [8, 32], strides = [1, 1]} : vector<8x128xf32> to vector<8x32xf32>
      %59 = vector.extract_strided_slice %54 {offsets = [0, 96], sizes = [8, 32], strides = [1, 1]} : vector<8x128xf32> to vector<8x32xf32>
      %c0_65 = arith.constant 0 : index
      %c0_66 = arith.constant 0 : index
      %60 = vector.load %arg15[%c0_65, %c0_66] : memref<8x32xf32, #tpu.memory_space<vmem>>, vector<8x32xf32>
      %61 = arith.mulf %57, %60 : vector<8x32xf32>
      %62 = arith.mulf %56, %58 : vector<8x32xf32>
      %63 = arith.addf %61, %62 : vector<8x32xf32>
      %64 = math.tanh %63 : vector<8x32xf32>
      %65 = arith.mulf %59, %64 : vector<8x32xf32>
      %c0_67 = arith.constant 0 : index
      %c0_68 = arith.constant 0 : index
      %66 = vector.load %arg15[%c0_67, %c0_68] : memref<8x32xf32, #tpu.memory_space<vmem>>, vector<8x32xf32>
      tpu.vector_store %arg15[%c0_67, %c0_68], %63 {strides = array<i32>} : memref<8x32xf32, #tpu.memory_space<vmem>>, vector<8x32xf32>,
      %c0_69 = arith.constant 0 : index
      %c0_70 = arith.constant 0 : index
      %67 = vector.load %arg14[%c0_69, %c0_70] : memref<8x32xf32, #tpu.memory_space<vmem>>, vector<8x32xf32>
      tpu.vector_store %arg14[%c0_69, %c0_70], %65 {strides = array<i32>} : memref<8x32xf32, #tpu.memory_space<vmem>>, vector<8x32xf32>,
      %c0_71 = arith.constant 0 : index
      %c0_72 = arith.constant 0 : index
      %68 = vector.load %arg16[%c0_71, %c0_72] : memref<8x32xf32, #tpu.memory_space<vmem>>, vector<8x32xf32>
      %69 = arith.addf %68, %65 : vector<8x32xf32>
      %c0_73 = arith.constant 0 : index
      %c0_74 = arith.constant 0 : index
      %70 = vector.load %arg16[%c0_73, %c0_74] : memref<8x32xf32, #tpu.memory_space<vmem>>, vector<8x32xf32>
      tpu.vector_store %arg16[%c0_73, %c0_74], %69 {strides = array<i32>} : memref<8x32xf32, #tpu.memory_space<vmem>>, vector<8x32xf32>,
    }
    %c8_i32_46 = arith.constant 8 : i32
    %c0_47 = arith.constant 0 : index
    %c0_48 = arith.constant 0 : index
    %32 = vector.load %arg16[%c0_47, %c0_48] : memref<8x32xf32, #tpu.memory_space<vmem>>, vector<8x32xf32>
    %cst_49 = arith.constant 1.250000e-01 : f32
    %33 = vector.broadcast %cst_49 : f32 to vector<8x32xf32>
    %34 = arith.mulf %32, %33 : vector<8x32xf32>
    %c0_50 = arith.constant 0 : index
    %c0_51 = arith.constant 0 : index
    %35 = vector.load %arg9[%c0_50, %c0_51] : memref<32x6xf32, #tpu.memory_space<vmem>>, vector<32x6xf32>
    %cst_52 = arith.constant dense<0.000000e+00> : vector<8x6xf32>
    %36 = tpu.matmul %34, %35, %cst_52 {dimension_numbers = #tpu.dot_dimension_numbers<[1], [0], [0], [1], [0, 0, 1, 1], [], []>} : vector<8x32xf32>, vector<32x6xf32>, vector<8x6xf32> -> vector<8x6xf32>
    %c0_53 = arith.constant 0 : index
    %c0_54 = arith.constant 0 : index
    %37 = vector.load %arg10[%c0_53, %c0_54] : memref<1x6xf32, #tpu.memory_space<vmem>>, vector<1x6xf32>
    %38 = vector.broadcast %37 : vector<1x6xf32> to vector<8x6xf32>
    %39 = arith.addf %36, %38 : vector<8x6xf32>
    %c0_55 = arith.constant 0 : index
    %c0_56 = arith.constant 0 : index
    %40 = vector.load %arg11[%c0_55, %c0_56] : memref<8x6xf32, #tpu.memory_space<vmem>>, vector<8x6xf32>
    tpu.vector_store %arg11[%c0_55, %c0_56], %39 {strides = array<i32>} : memref<8x6xf32, #tpu.memory_space<vmem>>, vector<8x6xf32>,
    return
  }
}

</mosaic_0001>

<bundles_post_ra>
// kernel: tpu_custom_call.1
= control target key start
LH: loop header
LB: loop body
LE: loop exit
PB: predicated region body
PF: predicated region fallthrough
CT: control target
= control target key end

     0   :  { %16 = vsyncpa [#allocation8], 0  ;;  %s1326_s0 = inlined_call_operand.vmem [shape: f32[64,32], index: 0, kind: input, shape index: {}]   ;;  %s1327_s1 = inlined_call_operand.vmem [shape: f32[32,128], index: 1, kind: input, shape index: {}]   ;;  %s1328_s2 = inlined_call_operand.vmem [shape: f32[32,128], index: 2, kind: input, shape index: {}]   ;;  %s1329_s3 = inlined_call_operand.vmem [shape: f32[1,128], index: 3, kind: input, shape index: {}]   ;;  %s1330_s4 = inlined_call_operand.vmem [shape: f32[32,128], index: 4, kind: input, shape index: {}]   ;;  %s1331_s5 = inlined_call_operand.hbm [shape: f32[32,128], index: 5, kind: input, shape index: {}]   ;;  %s1332_s6 = inlined_call_operand.vmem [shape: f32[1,128], index: 6, kind: input, shape index: {}]   ;;  %s1333_s7 = inlined_call_operand.vmem [shape: f32[2,8,32], index: 7, kind: input, shape index: {}]   ;;  %s1334_s8 = inlined_call_operand.vmem [shape: f32[2,8,32], index: 8, kind: input, shape index: {}]   ;;  %s1335_s9 = inlined_call_operand.vmem [shape: f32[32,6], index: 9, kind: input, shape index: {}]   ;;  %s1336_s10 = inlined_call_operand.vmem [shape: f32[1,6], index: 10, kind: input, shape index: {}]   ;;  %s1337_s11 = inlined_call_operand.hbm [shape: f32[8,6], index: 11, kind: output, shape index: {}]  }
   0x1   :  { %17 = vsyncpa [#allocation9], 0  ;;  %s1052_s17 = smov [#allocation7]   ;;  %s988_s21 = scalar_lea.hbm %s1331_s5, 512 }
   0x2   :  { %s33_s18 = sshll.u32 %s1052_s17, 4  ;;  %p989_p0 = scmp.ne.s32.totalorder %s1331_s5, %s988_s21  ;;  %s34_s18 = int_to_ptr.vmem [resolvable:$true] %s33_s18 }
   0x3   :  { %p992_p1 = scmp.lt.u32.totalorder %s988_s21, %s1331_s5 }
   0x5   :  { %p994_p2 = pnand %p992_p1, %p989_p0 }
   0x7   :  { %997 = shalt.err (!%p994_p2)
}
   0x8   :  { %s998_s26 = scalar_lea.vmem %s34_s18, 512  ;;  %p1003_p4 = scmp.lt.s32.totalorder %s34_s18, %s34_s18 }
   0x9   :  { %p999_p3 = scmp.ne.s32.totalorder %s34_s18, %s998_s26  ;;  %p1004_p5 = scmp.lt.s32.totalorder %s998_s26, %s998_s26 }
   0xb   :  { %p1005_p6 = por %p1004_p5, %p1003_p4 }
   0xd   :  { %p1006_p7 = pnand %p1005_p6, %p999_p3 }
   0xf   :  { %1009 = shalt.err (!%p1006_p7)
}
  0x10   :  { %s1053_s27 = smov 128   ;;  %s1054_s28 = smov 8  }
  0x11   :  { %39 = dma.hbm_to_vmem [thread:$0]  %s1331_s5, 512, %s34_s18, [#allocation8], %s1053_s27, %s1053_s27, %s1054_s28  }
  0x12   :  { %1040 = dma.done.wait [#allocation8], 512  }
  0x13   :  { %1041 = vsyncadd [#allocation8], 4294966784  ;;  %v1146_v0 = vld [vmem:[%s1328_s2] sm:$0xff]  ;;  %v1151_v1 = vld [vmem:[%s1328_s2 + $0x8] sm:$0xff]  ;;  %vm72_vm0 = vcmask 261120  }
  0x14   :  { %v1156_v2 = vld [vmem:[%s1328_s2 + $0x10] sm:$0xff]  ;;  %v1161_v3 = vld [vmem:[%s1328_s2 + $0x18] sm:$0xff]  ;;  %v61_v4 = vld [vmem:[%s1327_s1] sm:$0xff] }
  0x15   :  { %v62_v5 = vld [vmem:[%s1327_s1 + $0x8] sm:$0xff]  ;;  %v63_v7 = vld [vmem:[%s1327_s1 + $0x10] sm:$0xff]  ;;  %v64_v8 = vld [vmem:[%s1327_s1 + $0x18] sm:$0xff] }
  0x16   :  { %v895_v6 = vpack.c.bf16 %v62_v5, %v61_v4  ;;  %v53_v9 = vld [vmem:[%s1326_s0] sm:$0xff]  ;;  %v899_v10 = vpack.c.bf16 %v64_v8, %v63_v7  ;;  %v54_v14 = vld [vmem:[%s1326_s0 + $0x8] sm:$0xff]  ;;  %v55_v16 = vld [vmem:[%s1326_s0 + $0x10] sm:$0xff] }
  0x17   :  { %830 = vmatprep.mubr.msk.f32.mxu0 %vm72_vm0, %v53_v9  ;;  %v210_v11 = vld [vmem:[%s1333_s7] sm:$0xff]  ;;  %v58_v15 = vld [vmem:[%s1326_s0 + $0x28] sm:$0xff]  ;;  %v59_v17 = vld [vmem:[%s1326_s0 + $0x30] sm:$0xff] }
  0x18   :  { %v212_v12 = vld [vmem:[%s1334_s8] sm:$0xff]  ;;  %896 = vmatprep.subr.bf16.mxu0 %v895_v6  ;;  %929 = vmatprep.subr.bf16.mxu1 %v895_v6  ;;  %211 = vst.msk [vmem:[#allocation4] sm:$0xff] %vm72_vm0, %v210_v11  ;;  %v56_v18 = vld [vmem:[%s1326_s0 + $0x18] sm:$0xff] }
  0x19   :  { %213 = vst.msk [vmem:[#allocation5] sm:$0xff] %vm72_vm0, %v212_v12  ;;  %v57_v13 = vld [vmem:[%s1326_s0 + $0x20] sm:$0xff]  ;;  %898 = vmatpush3.bf16.msra.mxu0 %v895_v6  ;;  %931 = vmatpush3.bf16.msra.mxu1 %v895_v6  ;;  %v60_v19 = vld [vmem:[%s1326_s0 + $0x38] sm:$0xff]  ;;  %s1218_s0 = smov 0  }
  0x1a   :  { %900 = vmatprep.subr.bf16.mxu0 %v899_v10  ;;  %930 = vmatprep.subr.bf16.mxu1 %v899_v10  ;;  %v755_v20 = vld [vmem:[%s1329_s3] ss:$0 sm:$0xff] }
  0x1b   :  { %836 = vmatprep.mubr.msk.f32.mxu1 %vm72_vm0, %v57_v13 }
  0x1d   :  { %902 = vmatpush3.bf16.msra.mxu0 %v899_v10  ;;  %932 = vmatpush3.bf16.msra.mxu1 %v899_v10 }
  0x20   :  { %831 = vmatmul.mubr.msk.f32.vlgmr.msra.gmra.mrb[0].mxu0 %vm72_vm0, %v54_v14  ;;  %837 = vmatmul.mubr.msk.f32.vlgmr.msra.gmra.mrb[0].mxu1 %vm72_vm0, %v58_v15 }
  0x21   :  { %833 = vmatprep.mubr.msk.f32.mxu0 %vm72_vm0, %v55_v16  ;;  %839 = vmatprep.mubr.msk.f32.mxu1 %vm72_vm0, %v59_v17 }
  0x24   :  { %834 = vmatmul.mubr.msk.f32.gmra.mrb[2].mxu0 %vm72_vm0, %v56_v18  ;;  %840 = vmatmul.mubr.msk.f32.gmra.mrb[2].mxu1 %vm72_vm0, %v60_v19 }
  0xf3   :  { %v832_v21 = vpop.f32.mrb[0].mxu0  ;;  %v838_v22 = vpop.f32.mrb[0].mxu1 }
  0xf4   :  { %v169_v23 = vadd.f32 %v832_v21, %v755_v20  ;;  %v189_v24 = vadd.f32 %v838_v22, %v755_v20  ;;  %v163_v25 = vpop.f32.mrb[1].mxu0  ;;  %v183_v26 = vpop.f32.mrb[1].mxu1 }
  0xf5   :  { %v164_v27 = vadd.f32 %v755_v20, %v163_v25  ;;  %v184_v28 = vadd.f32 %v755_v20, %v183_v26 }
  0xf6   :  { %203 = vst [vmem:[#allocation2 + $0x8] sm:$0xff] %v169_v23  ;;  %207 = vst [vmem:[#allocation2 + $0x28] sm:$0xff] %v189_v24 }
  0xf7   :  { %202 = vst [vmem:[#allocation2] sm:$0xff] %v164_v27  ;;  %206 = vst [vmem:[#allocation2 + $0x20] sm:$0xff] %v184_v28  ;;  %v835_v29 = vpop.f32.mrb[2].mxu0  ;;  %v841_v30 = vpop.f32.mrb[2].mxu1 }
  0xf8   :  { %v179_v31 = vadd.f32 %v835_v29, %v755_v20  ;;  %v199_v32 = vadd.f32 %v841_v30, %v755_v20  ;;  %v173_v33 = vpop.f32.mrb[3].mxu0  ;;  %v193_v34 = vpop.f32.mrb[3].mxu1 }
  0xf9   :  { %v174_v35 = vadd.f32 %v755_v20, %v173_v33  ;;  %v194_v36 = vadd.f32 %v755_v20, %v193_v34 }
  0xfa   :  { %205 = vst [vmem:[#allocation2 + $0x18] sm:$0xff] %v179_v31  ;;  %209 = vst [vmem:[#allocation2 + $0x38] sm:$0xff] %v199_v32 }
  0xfb   :  { %204 = vst [vmem:[#allocation2 + $0x10] sm:$0xff] %v174_v35  ;;  %208 = vst [vmem:[#allocation2 + $0x30] sm:$0xff] %v194_v36 }
  0xfc LB: > { %v904_v37 = vpack.c.bf16 %v1151_v1, %v1146_v0  ;;  %v1055_v38 = vmov 0.0|0.0   ;;  %v907_v39 = vpack.c.bf16 %v1161_v3, %v1156_v2  ;;  %vm1056_vm1 = vmmov 0   ;;  %v225_v41 = vld [vmem:[#allocation4] sm:$0xff]  ;;  %s764_s3 = sshll.u32 %s1046_s0, 3  ;;  %s1058_s2 = smov 64   ;;  %v309_v47 = vld [vmem:[#allocation5] sm:$0xff]  ;;  %s1046_s0 = sphi %s1218_s0, %s223_s0  }
  0xfd   : > { %903 = vmatprep.subr.bf16.mxu0 %v1055_v38  ;;  %v1057_v40 = vmov 0.0   ;;  %s226_s27 = scalar_lea.vmem [#allocation2], %s764_s3  ;;  %s1059_s28 = smov 32  }
  0xfe   : > { %905 = vmatpush3.bf16.msra.mxu0 %v904_v37  ;;  %850 = vmatprep.mubr.msk.f32.mxu0 %vm1056_vm1, %v1057_v40  ;;  %s1060_s29 = smov 96   ;;  %s341_s30 = scalar_lea.vmem [#allocation3], %s764_s3 }
  0xff   : > { %906 = vmatprep.subr.bf16.mxu0 %v1055_v38  ;;  %s223_s0 = sadd.s32 1, %s1046_s0  }
 0x100   : > { %p220_p8 = scmp.ge.s32.totalorder %s223_s0, 8  }
 0x101   :  { %v351_v63 = vld [vmem:[%s1330_s4] sm:$0xff] (%p220_p8)  ;;  %v352_v4 = vld [vmem:[%s1330_s4 + $0x8] sm:$0xff] (%p220_p8)  ;;  %v353_v5 = vld [vmem:[%s1330_s4 + $0x10] sm:$0xff] (%p220_p8)  ;;  %v1061_v15 = vmov (%p220_p8), 0.0  }
 0x102   : > { %908 = vmatpush3.bf16.msra.mxu0 %v907_v39  ;;  %v227_v42 = vld [vmem:[%s226_s27] sm:$0xff]  ;;  %v909_v6 = vpack.c.bf16 (%p220_p8), %v352_v4, %v351_v63  ;;  %v354_v7 = vld [vmem:[%s1330_s4 + $0x18] sm:$0xff] (%p220_p8)  ;;  %v776_v13 = vld [vmem:[%s1333_s7 + $0x8] sm:$0xff] (%p220_p8)  ;;  %505 = vst.msk [vmem:[#allocation6] sm:$0xff] (%p220_p8), %vm72_vm0, %v1061_v15 }
 0x103   :  { %v913_v10 = vpack.c.bf16 (%p220_p8), %v354_v7, %v353_v5  ;;  %v777_v14 = vld [vmem:[%s1334_s8 + $0x8] sm:$0xff] (%p220_p8)  ;;  %v1269_v16 = vld [vmem:[#allocation7] sm:$0xff] (%p220_p8)  ;;  %v1271_v17 = vld [vmem:[#allocation7 + $0x8] sm:$0xff] (%p220_p8) }
 0x104   :  { %910 = vmatprep.subr.bf16.mxu0 (%p220_p8), %v909_v6  ;;  %933 = vmatprep.subr.bf16.mxu1 (%p220_p8), %v909_v6  ;;  %v1273_v18 = vld [vmem:[#allocation7 + $0x10] sm:$0xff] (%p220_p8)  ;;  %v1275_v19 = vld [vmem:[#allocation7 + $0x18] sm:$0xff] (%p220_p8)  ;;  %v767_v20 = vld [vmem:[%s1332_s6] ss:$0 sm:$0xff] (%p220_p8)  ;;  %s1280_s6 = smov (%p220_p8), 0  }
 0x105   : > { %851 = vmatmul.mubr.msk.f32.vlgmr.msra.gmra.mrb[0].mxu0 %vm72_vm0, %v225_v41  ;;  %935 = vmatpush3.bf16.msra.mxu1 (%p220_p8), %v909_v6 }
 0x106   :  { %912 = vmatpush3.bf16.msra.mxu0 (%p220_p8), %v909_v6  ;;  %934 = vmatprep.subr.bf16.mxu1 (%p220_p8), %v913_v10 }
 0x107   :  { %914 = vmatprep.subr.bf16.mxu0 (%p220_p8), %v913_v10 }
 0x109   :  { %936 = vmatpush3.bf16.msra.mxu1 (%p220_p8), %v913_v10 }
 0x10a   :  { %916 = vmatpush3.bf16.msra.mxu0 (%p220_p8), %v913_v10 }
 0x1d8   : > { %v297_v43 = vpop.f32.mrb[0].mxu0 }
 0x1d9   : > { %v301_v44 = vadd.f32 %v297_v43, %v227_v42  ;;  %v852_v45 = vpop.f32.mrb[1].mxu0 }
 0x1db   : > { %972 = vtanh.f32 %v301_v44  ;;  %v766_v48 = vmul.f32 -1.442695, %v301_v44 }
 0x1dd   : > { %974 = vpow2.f32 %v766_v48 }
 0x1e5   : > { %v973_v46 = vpop.eup %972 }
 0x1e6   : > { %316 = vrot.lane.b32.xlu0 %v973_v46, %s1058_s2 }
 0x1e7   : > { %v975_v49 = vpop.eup %974 }
 0x1e8   : > { %v305_v50 = vadd.f32 1.0, %v975_v49 }
 0x1ea   : > { %311 = vrot.lane.b32.xlu0 %v309_v47, %s1059_s28  ;;  %976 = vrcp.f32 %v305_v50 }
 0x1f4   : > { %v977_v51 = vpop.eup %976 }
 0x258   : > { %v317_v52 = vpop.permute.xlu0 %316 }
 0x259   : > { %v319_v53 = vmul.f32 %v977_v51, %v317_v52 }
 0x25b   : > { %321 = vrot.lane.b32.xlu1 %v319_v53, %s1059_s28 }
 0x25c   : > { %v312_v54 = vpop.permute.xlu0 %311 }
 0x25d   : > { %v314_v55 = vmul.f32 %v977_v51, %v312_v54 }
 0x2cd   : > { %v322_v56 = vpop.permute.xlu1 %321 }
 0x2ce   : > { %v324_v57 = vadd.f32 %v322_v56, %v314_v55 }
 0x2d0   : > { %978 = vtanh.f32 %v324_v57  ;;  %332 = vrot.lane.b32.xlu0 %v324_v57, %s1060_s29 }
 0x2da   : > { %v979_v58 = vpop.eup %978 }
 0x2db   : > { %327 = vrot.lane.b32.xlu1 %v979_v58, %s1058_s2 }
 0x342   : > { %v333_v59 = vpop.permute.xlu0 %332 }
 0x343   : > { %335 = vst.msk [vmem:[#allocation5] sm:$0xff] %vm72_vm0, %v333_v59 }
 0x344   :  { %504 = vst.msk [vmem:[#allocation5] sm:$0xff] (%p220_p8), %vm72_vm0, %v777_v14 }
 0x34d   : > { %v328_v60 = vpop.permute.xlu1 %327 }
 0x34e   : > { %v330_v61 = vmul.f32 %v977_v51, %v328_v60 }
 0x350   : > { %337 = vrot.lane.b32.xlu1 %v330_v61, %s1059_s28 }
 0x3bd   :  { %222 = sbr.rel (!%p220_p8) target bundleno = 252 (0xfc), region = 87 }
 0x3c2   : > { %v338_v62 = vpop.permute.xlu1 %337 }
 0x3c3   : > { %340 = vst.msk [vmem:[#allocation4] sm:$0xff] %vm72_vm0, %v338_v62  ;;  %342 = vst.msk [vmem:[%s341_s30] sm:$0xff] %vm72_vm0, %v338_v62 }
 0x3c4   :  { %501 = vst.msk [vmem:[#allocation4] sm:$0xff] %vm72_vm0, %v776_v13 }
 0x3ca   :  { %v343_v8 = vld [vmem:[#allocation3] sm:$0xff]  ;;  %v344_v0 = vld [vmem:[#allocation3 + $0x8] sm:$0xff]  ;;  %v345_v2 = vld [vmem:[#allocation3 + $0x10] sm:$0xff] }
 0x3cb   :  { %v347_v9 = vld [vmem:[#allocation3 + $0x20] sm:$0xff]  ;;  %861 = vmatprep.mubr.msk.f32.mxu0 %vm72_vm0, %v343_v8  ;;  %v348_v1 = vld [vmem:[#allocation3 + $0x28] sm:$0xff]  ;;  %v349_v3 = vld [vmem:[#allocation3 + $0x30] sm:$0xff] }
 0x3cc   :  { %867 = vmatprep.mubr.msk.f32.mxu1 %vm72_vm0, %v347_v9  ;;  %862 = vmatmul.mubr.msk.f32.vlgmr.msra.gmra.mrb[0].mxu0 %vm72_vm0, %v344_v0  ;;  %v346_v11 = vld [vmem:[#allocation3 + $0x18] sm:$0xff] }
 0x3cd   :  { %868 = vmatmul.mubr.msk.f32.vlgmr.msra.gmra.mrb[0].mxu1 %vm72_vm0, %v348_v1  ;;  %864 = vmatprep.mubr.msk.f32.mxu0 %vm72_vm0, %v345_v2  ;;  %v350_v12 = vld [vmem:[#allocation3 + $0x38] sm:$0xff] }
 0x3ce   :  { %870 = vmatprep.mubr.msk.f32.mxu1 %vm72_vm0, %v349_v3 }
 0x3d0   :  { %865 = vmatmul.mubr.msk.f32.gmra.mrb[2].mxu0 %vm72_vm0, %v346_v11 }
 0x3d1   :  { %871 = vmatmul.mubr.msk.f32.gmra.mrb[2].mxu1 %vm72_vm0, %v350_v12 }
 0x49f   :  { %v863_v21 = vpop.f32.mrb[0].mxu0 }
 0x4a0   :  { %v869_v22 = vpop.f32.mrb[0].mxu1  ;;  %v458_v23 = vadd.f32 %v863_v21, %v767_v20  ;;  %v452_v25 = vpop.f32.mrb[1].mxu0 }
 0x4a1   :  { %v478_v24 = vadd.f32 %v869_v22, %v767_v20  ;;  %v472_v26 = vpop.f32.mrb[1].mxu1  ;;  %v453_v27 = vadd.f32 %v767_v20, %v452_v25 }
 0x4a2   :  { %v473_v28 = vadd.f32 %v767_v20, %v472_v26  ;;  %492 = vst [vmem:[#allocation2 + $0x8] sm:$0xff] %v458_v23 }
 0x4a3   :  { %496 = vst [vmem:[#allocation2 + $0x28] sm:$0xff] %v478_v24  ;;  %491 = vst [vmem:[#allocation2] sm:$0xff] %v453_v27  ;;  %v866_v29 = vpop.f32.mrb[2].mxu0 }
 0x4a4   :  { %495 = vst [vmem:[#allocation2 + $0x20] sm:$0xff] %v473_v28  ;;  %v872_v30 = vpop.f32.mrb[2].mxu1  ;;  %v468_v31 = vadd.f32 %v866_v29, %v767_v20  ;;  %v462_v33 = vpop.f32.mrb[3].mxu0 }
 0x4a5   :  { %v488_v32 = vadd.f32 %v872_v30, %v767_v20  ;;  %v482_v34 = vpop.f32.mrb[3].mxu1  ;;  %v463_v35 = vadd.f32 %v767_v20, %v462_v33 }
 0x4a6   :  { %v483_v36 = vadd.f32 %v767_v20, %v482_v34  ;;  %494 = vst [vmem:[#allocation2 + $0x18] sm:$0xff] %v468_v31 }
 0x4a7   :  { %498 = vst [vmem:[#allocation2 + $0x38] sm:$0xff] %v488_v32  ;;  %493 = vst [vmem:[#allocation2 + $0x10] sm:$0xff] %v463_v35 }
 0x4a8   :  { %497 = vst [vmem:[#allocation2 + $0x30] sm:$0xff] %v483_v36 }
 0x4a9 LB: > { %v918_v37 = vpack.c.bf16 %v1271_v17, %v1269_v16  ;;  %v1062_v38 = vmov 0.0|0.0   ;;  %v921_v39 = vpack.c.bf16 %v1275_v19, %v1273_v18  ;;  %vm1063_vm2 = vmmov 0   ;;  %v517_v41 = vld [vmem:[#allocation4] sm:$0xff]  ;;  %s778_s8 = sshll.u32 %s1050_s6, 3  ;;  %s1065_s23 = smov 64   ;;  %v601_v47 = vld [vmem:[#allocation5] sm:$0xff]  ;;  %s1050_s6 = sphi %s1280_s6, %s515_s6  }
 0x4aa   : > { %917 = vmatprep.subr.bf16.mxu0 %v1062_v38  ;;  %v1064_v40 = vmov 0.0   ;;  %s518_s22 = scalar_lea.vmem [#allocation2], %s778_s8  ;;  %s1066_s24 = smov 32   ;;  %v633_v62 = vld [vmem:[#allocation6] sm:$0xff] }
 0x4ab   : > { %919 = vmatpush3.bf16.msra.mxu0 %v918_v37  ;;  %881 = vmatprep.mubr.msk.f32.mxu0 %vm1063_vm2, %v1064_v40  ;;  %s1067_s25 = smov 96   ;;  %s515_s6 = sadd.s32 1, %s1050_s6  }
 0x4ac   : > { %920 = vmatprep.subr.bf16.mxu0 %v1062_v38  ;;  %p512_p9 = scmp.ge.s32.totalorder %s515_s6, 8  }
 0x4ad   :  { %v638_v5 = vld [vmem:[%s1335_s9] sm:$0xff] (%p512_p9)  ;;  %v639_v6 = vld [vmem:[%s1335_s9 + $0x8] sm:$0xff] (%p512_p9)  ;;  %v640_v7 = vld [vmem:[%s1335_s9 + $0x10] sm:$0xff] (%p512_p9)  ;;  %v1068_v8 = vmov (%p512_p9), 0.0|0.0   ;;  %vm1069_vm3 = vmmov (%p512_p9), 0   ;;  %s1070_s13 = smov (%p512_p9), [#allocation10]  }
 0x4ae   :  { %v924_v9 = vpack.c.bf16 (%p512_p9), %v639_v6, %v638_v5  ;;  %v641_v10 = vld [vmem:[%s1335_s9 + $0x18] sm:$0xff] (%p512_p9)  ;;  %v781_v3 = vld [vmem:[%s1336_s10] ss:$0 sm:$0xff] (%p512_p9)  ;;  %s730_s14 = sshll.u32 (%p512_p9), %s1070_s13, 4  ;;  %vm722_vm4 = vcmask (%p512_p9), 48128   ;;  %s731_s14 = int_to_ptr.vmem [resolvable:$true] %s730_s14 }
 0x4af   : > { %922 = vmatpush3.bf16.msra.mxu0 %v921_v39  ;;  %v519_v42 = vld [vmem:[%s518_s22] sm:$0xff]  ;;  %v927_v0 = vpack.c.bf16 (%p512_p9), %v641_v10, %v640_v7  ;;  %s1010_s9 = scalar_lea.vmem (%p512_p9), %s731_s14, 128  ;;  %p1015_p11 = scmp.lt.s32.totalorder (%p512_p9), %s731_s14, %s731_s14 }
 0x4b0   :  { %923 = vmatprep.subr.bf16.mxu0 (%p512_p9), %v1068_v8  ;;  %p1011_p10 = scmp.ne.s32.totalorder (%p512_p9), %s731_s14, %s1010_s9  ;;  %p1016_p12 = scmp.lt.s32.totalorder (%p512_p9), %s1010_s9, %s1010_s9 }
 0x4b2   : > { %882 = vmatmul.mubr.msk.f32.vlgmr.msra.gmra.mrb[0].mxu0 %vm72_vm0, %v517_v41  ;;  %p1017_p13 = por (%p512_p9), %p1016_p12, %p1015_p11 }
 0x4b3   :  { %892 = vmatprep.mubr.msk.f32.mxu0 (%p512_p9), %vm1069_vm3, %v1061_v15  ;;  %925 = vmatpush3.bf16.msra.mxu0 (%p512_p9), %v924_v9 }
 0x4b4   :  { %926 = vmatprep.subr.bf16.mxu0 (%p512_p9), %v1068_v8  ;;  %p1018_p0 = pnand (%p512_p9), %p1017_p13, %p1011_p10 }
 0x4b7   :  { %928 = vmatpush3.bf16.msra.mxu0 (%p512_p9), %v927_v0 }
 0x585   : > { %v589_v43 = vpop.f32.mrb[0].mxu0 }
 0x586   : > { %v593_v44 = vadd.f32 %v589_v43, %v519_v42  ;;  %v883_v45 = vpop.f32.mrb[1].mxu0 }
 0x588   : > { %980 = vtanh.f32 %v593_v44  ;;  %v780_v48 = vmul.f32 -1.442695, %v593_v44 }
 0x58a   : > { %982 = vpow2.f32 %v780_v48 }
 0x592   : > { %v981_v46 = vpop.eup %980 }
 0x593   : > { %608 = vrot.lane.b32.xlu0 %v981_v46, %s1065_s23 }
 0x594   : > { %v983_v49 = vpop.eup %982 }
 0x595   : > { %v597_v50 = vadd.f32 1.0, %v983_v49 }
 0x597   : > { %603 = vrot.lane.b32.xlu0 %v601_v47, %s1066_s24  ;;  %984 = vrcp.f32 %v597_v50 }
 0x5a1   : > { %v985_v51 = vpop.eup %984 }
 0x605   : > { %v609_v52 = vpop.permute.xlu0 %608 }
 0x606   : > { %v611_v53 = vmul.f32 %v985_v51, %v609_v52 }
 0x608   : > { %613 = vrot.lane.b32.xlu1 %v611_v53, %s1066_s24 }
 0x609   : > { %v604_v54 = vpop.permute.xlu0 %603 }
 0x60a   : > { %v606_v55 = vmul.f32 %v985_v51, %v604_v54 }
 0x67a   : > { %v614_v56 = vpop.permute.xlu1 %613 }
 0x67b   : > { %v616_v57 = vadd.f32 %v614_v56, %v606_v55 }
 0x67d   : > { %986 = vtanh.f32 %v616_v57 }
 0x687   : > { %v987_v58 = vpop.eup %986 }
 0x688   : > { %619 = vrot.lane.b32.xlu1 %v987_v58, %s1065_s23 }
 0x68c   : > { %624 = vrot.lane.b32.xlu1 %v616_v57, %s1067_s25 }
 0x6fa   : > { %v620_v59 = vpop.permute.xlu1 %619 }
 0x6fb   : > { %v622_v60 = vmul.f32 %v985_v51, %v620_v59 }
 0x6fd   : > { %629 = vrot.lane.b32.xlu0 %v622_v60, %s1066_s24 }
 0x6fe   : > { %v625_v61 = vpop.permute.xlu1 %624 }
 0x6ff   : > { %627 = vst.msk [vmem:[#allocation5] sm:$0xff] %vm72_vm0, %v625_v61 }
 0x76c   :  { %514 = sbr.rel (!%p512_p9) target bundleno = 1193 (0x4a9), region = 98 }
 0x76f   : > { %v630_v63 = vpop.permute.xlu0 %629 }
 0x770   : > { %632 = vst.msk [vmem:[#allocation4] sm:$0xff] %vm72_vm0, %v630_v63  ;;  %v634_v4 = vadd.f32 %v633_v62, %v630_v63 }
 0x772   : > { %635 = vst.msk [vmem:[#allocation6] sm:$0xff] %vm72_vm0, %v634_v4 }
 0x779   :  { %v636_v1 = vld [vmem:[#allocation6] sm:$0xff] }
 0x77a   :  { %v637_v2 = vmul.f32 0.125, %v636_v1 }
 0x77c   :  { %893 = vmatmul.mubr.msk.f32.vlgmr.msra.gmra.mrb[0].mxu0 %vm72_vm0, %v637_v2 }
 0x84f   :  { %v718_v11 = vpop.f32.mrb[0].mxu0 }
 0x850   :  { %v719_v12 = vadd.f32 %v781_v3, %v718_v11  ;;  %v894_v13 = vpop.f32.mrb[1].mxu0 }
 0x852   :  { %723 = vst.msk [vmem:[#allocation10] sm:$0xff] %vm722_vm4, %v719_v12 }
 0x853   :  { %1021 = shalt.err (!%p1018_p0)
}
 0x854   :  { %s1022_s17 = scalar_lea.hbm %s1337_s11, 128 }
 0x855   :  { %p1023_p1 = scmp.ne.s32.totalorder %s1337_s11, %s1022_s17  ;;  %p1026_p2 = scmp.lt.u32.totalorder %s1022_s17, %s1337_s11 }
 0x857   :  { %p1028_p3 = pnand %p1026_p2, %p1023_p1 }
 0x859   :  { %1031 = shalt.err (!%p1028_p3)
}
 0x85a   :  { %733 = dma.vmem_to_hbm [thread:$0]  %s731_s14, 128, %s1337_s11, [#allocation9]  }
 0x85b   :  { %1042 = dma.done.wait [#allocation9], 128  }
 0x85c   :  { %1043 = vsyncadd [#allocation9], 4294967168 }
 0x85d   :  { %737 = vsyncpa [#allocation8], 1 }
 0x85e   :  { %738 = vsyncpa [#allocation9], 1 }

</bundles_post_ra>
